<compile_context>
chip_gen: v7x
topology: tpu7x:2x2x1
jax: 0.10.0
libtpu: 0.0.40
codegen_flags: <defaults>
</compile_context>

<pallas_src>
import numpy as np
import jax
import jax.numpy as jnp
from jax import lax
from jax.experimental import pallas as pl
from jax.experimental.pallas import tpu as pltpu


# ----------------------------------------------------------------------------
# Configuration (mirrors MultiDiffusion.__init__)
# ----------------------------------------------------------------------------
def step_cnt(small, stride, large):
    return None if large < small or (large - small) % stride != 0 else (large - small) // stride + 1


def to_tuple(x):
    return (x, x) if isinstance(x, int) else x


B, C = 2, 4
BASE_SIZE = to_tuple(8)        # base_model operates on 8x8 tiles
TARGET_SIZE = to_tuple(16)     # full image is 16x16
STRIDE = to_tuple(4)

_sw = step_cnt(BASE_SIZE[0], STRIDE[0], TARGET_SIZE[0])
_sh = step_cnt(BASE_SIZE[1], STRIDE[1], TARGET_SIZE[1])
if _sw is None or _sh is None:
    raise ValueError("Invalid size/stride combination")
STEPS = (_sw, _sh)
S0, S1 = TARGET_SIZE
BW, BH = BASE_SIZE
T = STEPS[0] * STEPS[1]          # number of sliding-window tiles (9)
HW = S0 * S1                     # lane-dense spatial extent (256)
ROWS = B * C                     # batch folded into sublanes (8)
NP = ROWS + 2                    # params columns: [W_blockdiag | bias | sigma]
TILE_AREA = float(BW * BW)       # torch slices the model *input* with base_size[0] twice


# ----------------------------------------------------------------------------
# Pallas kernel: single invocation, one (ROWS, HW) = (8, 256) slab in VMEM
# ----------------------------------------------------------------------------
def multidiffusion_kernel(x_ref, p_ref, msk_ref, ksh_ref, o_ref):
    x = x_ref[...]                          # (ROWS, HW)
    p = p_ref[...]                          # (ROWS, ROWS + 2)
    w_bd = p[:, :ROWS]                      # block-diagonal kron(I_B, w): no cross-batch mixing
    bias = p[:, ROWS:ROWS + 1]              # (ROWS, 1) bias tiled over batch
    sig = p[:, ROWS + 1:ROWS + 2]           # (ROWS, 1) per-batch sigma replicated over channels

    # base_model part 1: 1x1 channel-mixing conv + bias, one MXU matmul.
    mixed = jnp.dot(w_bd, x,
                    precision=lax.Precision.HIGHEST,
                    preferred_element_type=jnp.float32) + bias          # (ROWS, HW)

    # All T per-tile masked spatial means in one MXU matmul (1/area pre-folded;
    # mask matrix pre-transposed host-side -> plain (M,K)@(K,N)).
    mu_all = jnp.dot(mixed, msk_ref[...],
                     precision=lax.Precision.HIGHEST,
                     preferred_element_type=jnp.float32)                # (ROWS, T)

    # Sliding-window accumulation.  ksh[t] is zero outside tile t's window and
    # is already divided by the summed blending weights, so the full-size
    # product IS `outputs[..., w0:w0+BW, h0:h0+BH] += model_out * kernel / weights`.
    acc = jnp.zeros((ROWS, HW), jnp.float32)
    for t in range(T):                      # statically unrolled (T = 9)
        acc = acc + jnp.tanh(mixed - mu_all[:, t:t + 1]) * ksh_ref[t]
    o_ref[...] = acc * sig                  # sigma applied once, after the loop


# ----------------------------------------------------------------------------
# Host-side constant construction (run exactly once, cached as device arrays)
# ----------------------------------------------------------------------------
def build_constants(w_mix, bias, kernel):
    kshift = np.zeros((T, S0, S1), np.float32)
    masks = np.zeros((T, S0, S1), np.float32)
    k_np = np.asarray(kernel, np.float32)
    t = 0
    for i in range(STEPS[0]):
        for j in range(STEPS[1]):
            w0, h0 = STRIDE[0] * i, STRIDE[1] * j
            kshift[t, w0:w0 + BW, h0:h0 + BH] = k_np
            # NOTE: the torch code slices the model *input* with base_size[0] on
            # BOTH spatial dims; the mean mask follows that convention.
            masks[t, w0:w0 + BW, h0:h0 + BW] = 1.0
            t += 1

    wgt = kshift.sum(axis=0)                     # summed blending window ("weights")
    if wgt.min() <= 0.0:
        raise ValueError("sliding windows do not cover every pixel (0/0 in outputs/weights)")

    # Kernel planes / weights, pre-broadcast across the 8 packed rows.
    ksh = np.broadcast_to((kshift / wgt[None]).reshape(T, 1, HW), (T, ROWS, HW)).copy()
    # Mean masks / area, pre-transposed to (HW, T).
    msk_t = np.ascontiguousarray((masks / TILE_AREA).reshape(T, HW).T)
    # [block-diagonal 1x1-conv weight | tiled bias]; sigma column appended per call.
    w_bd = np.kron(np.eye(B, dtype=np.float32),
                   np.asarray(w_mix, np.float32).reshape(C, C))         # (ROWS, ROWS)
    b_col = np.tile(np.asarray(bias, np.float32).reshape(C), B).reshape(ROWS, 1)
    wb = np.concatenate([w_bd, b_col], axis=1)                          # (ROWS, ROWS + 1)
    return jnp.asarray(wb), jnp.asarray(msk_t), jnp.asarray(ksh)


# ----------------------------------------------------------------------------
# Jitted forward wrapper
# ----------------------------------------------------------------------------
@jax.jit
def multidiffusion_forward(x_noisy, sigmas, wb, msk_t, ksh):
    x2d = x_noisy.astype(jnp.float32).reshape(ROWS, HW)                 # contiguous -> free
    sig_col = jnp.repeat(sigmas.astype(jnp.float32), C).reshape(ROWS, 1)
    params = jnp.concatenate([wb, sig_col], axis=1)                     # (ROWS, ROWS + 2)

    out = pl.pallas_call(
        multidiffusion_kernel,
        out_shape=jax.ShapeDtypeStruct((ROWS, HW), jnp.float32),
        in_specs=[
            pl.BlockSpec(memory_space=pltpu.MemorySpace.VMEM),          # x       (8, 256)
            pl.BlockSpec(memory_space=pltpu.MemorySpace.VMEM),          # params  (8, 10)
            pl.BlockSpec(memory_space=pltpu.MemorySpace.VMEM),          # masks^T (256, T)
            pl.BlockSpec(memory_space=pltpu.MemorySpace.VMEM),          # kernels (T, 8, 256)
        ],
        out_specs=pl.BlockSpec(memory_space=pltpu.MemorySpace.VMEM),
    )(x2d, params, msk_t, ksh)
    return out.reshape(B, C, S0, S1)


# ----------------------------------------------------------------------------
# Pure-JAX reference (verbatim translation of the PyTorch forward loop, NCHW)
# ----------------------------------------------------------------------------
def base_model_ref(x_tile, sigmas, w_mix, bias):
    mixed = jnp.einsum("oc,bchw->bohw", w_mix, x_tile,
                       precision=lax.Precision.HIGHEST) + bias[None, :, None, None]
    mu = jnp.mean(mixed, axis=(2, 3), keepdims=True)
    return jnp.tanh(mixed - mu) * sigmas[:, None, None, None]


def multidiffusion_ref(x, sigmas, w_mix, bias, kernel):
    outputs = jnp.zeros_like(x)
    weights = jnp.zeros_like(x)
    k4 = kernel[None, None, :, :]
    for i in range(STEPS[0]):
        for j in range(STEPS[1]):
            w0 = STRIDE[0] * i
            h0 = STRIDE[1] * j
            mo = base_model_ref(
                x[:, :, w0:w0 + BASE_SIZE[0], h0:h0 + BASE_SIZE[0]],
                sigmas, w_mix, bias) * k4
            outputs = outputs.at[:, :, w0:w0 + BASE_SIZE[0], h0:h0 + BASE_SIZE[1]].add(mo)
            weights = weights.at[:, :, w0:w0 + BASE_SIZE[0], h0:h0 + BASE_SIZE[1]].add(
                jnp.broadcast_to(k4, mo.shape))
    return outputs / weights


# ----------------------------------------------------------------------------
if __name__ == "__main__":
    key = jax.random.PRNGKey(0)
    kx, ks, kw, kb = jax.random.split(key, 4)

    x_noisy = jax.random.normal(kx, (B, C, S0, S1), jnp.float32)
    sigmas = jnp.abs(jax.random.normal(ks, (B,), jnp.float32)) + 0.5
    w_mix = jax.random.normal(kw, (C, C), jnp.float32) * 0.5          # base_model 1x1-conv weight
    bias = jax.random.normal(kb, (C,), jnp.float32) * 0.1             # base_model bias

    # Deterministic Gaussian blending window (the nn.Parameter `kernel`)
    ii = jnp.arange(BW, dtype=jnp.float32) - (BW - 1) / 2.0
    jj = jnp.arange(BH, dtype=jnp.float32) - (BH - 1) / 2.0
    kernel = jnp.exp(-(ii[:, None] ** 2 + jj[None, :] ** 2) / (2.0 * 3.0 ** 2))

    # Constants built once (host numpy), cached as device arrays.
    wb, msk_t, ksh = build_constants(w_mix, bias, kernel)

    out = multidiffusion_forward(x_noisy, sigmas, wb, msk_t, ksh)
    out = jax.block_until_ready(out)

    ref = multidiffusion_ref(x_noisy, sigmas, w_mix, bias, kernel)
    np.testing.assert_allclose(np.asarray(out), np.asarray(ref), rtol=1e-4, atol=1e-4)

    print("KERNEL_OK")
</pallas_src>

<mosaic_0001>
module attributes {stable_mosaic.version = 11 : i64} {
  func.func @multidiffusion_kernel(%arg0: memref<8x256xf32, #tpu.memory_space<vmem>>, %arg1: memref<8x10xf32, #tpu.memory_space<vmem>>, %arg2: memref<256x9xf32, #tpu.memory_space<vmem>>, %arg3: memref<9x8x256xf32, #tpu.memory_space<vmem>>, %arg4: memref<8x256xf32, #tpu.memory_space<vmem>>) attributes {dimension_semantics = [], scalar_prefetch = 0 : i64, scratch_operands = 0 : i64, tpu.core_type = #tpu.core_type<tc>} {
    %c0 = arith.constant 0 : index
    %c0_0 = arith.constant 0 : index
    %0 = vector.load %arg0[%c0, %c0_0] : memref<8x256xf32, #tpu.memory_space<vmem>>, vector<8x256xf32>
    %c0_1 = arith.constant 0 : index
    %c0_2 = arith.constant 0 : index
    %1 = vector.load %arg1[%c0_1, %c0_2] : memref<8x10xf32, #tpu.memory_space<vmem>>, vector<8x10xf32>
    %2 = vector.extract_strided_slice %1 {offsets = [0, 0], sizes = [8, 8], strides = [1, 1]} : vector<8x10xf32> to vector<8x8xf32>
    %3 = vector.extract_strided_slice %1 {offsets = [0, 8], sizes = [8, 1], strides = [1, 1]} : vector<8x10xf32> to vector<8x1xf32>
    %4 = vector.extract_strided_slice %1 {offsets = [0, 9], sizes = [8, 1], strides = [1, 1]} : vector<8x10xf32> to vector<8x1xf32>
    %cst = arith.constant dense<0.000000e+00> : vector<8x256xf32>
    %5 = tpu.matmul %2, %0, %cst {dimension_numbers = #tpu.dot_dimension_numbers<[1], [0], [0], [1], [0, 0, 1, 1], [], []>, precision = #tpu.contract_precision<fp32>} : vector<8x8xf32>, vector<8x256xf32>, vector<8x256xf32> -> vector<8x256xf32>
    %6 = vector.broadcast %3 : vector<8x1xf32> to vector<8x256xf32>
    %7 = arith.addf %5, %6 : vector<8x256xf32>
    %c0_3 = arith.constant 0 : index
    %c0_4 = arith.constant 0 : index
    %8 = vector.load %arg2[%c0_3, %c0_4] : memref<256x9xf32, #tpu.memory_space<vmem>>, vector<256x9xf32>
    %cst_5 = arith.constant dense<0.000000e+00> : vector<8x9xf32>
    %9 = tpu.matmul %7, %8, %cst_5 {dimension_numbers = #tpu.dot_dimension_numbers<[1], [0], [0], [1], [0, 0, 1, 1], [], []>, precision = #tpu.contract_precision<fp32>} : vector<8x256xf32>, vector<256x9xf32>, vector<8x9xf32> -> vector<8x9xf32>
    %cst_6 = arith.constant 0.000000e+00 : f32
    %10 = vector.broadcast %cst_6 : f32 to vector<8x256xf32>
    %11 = vector.extract_strided_slice %9 {offsets = [0, 0], sizes = [8, 1], strides = [1, 1]} : vector<8x9xf32> to vector<8x1xf32>
    %12 = vector.broadcast %11 : vector<8x1xf32> to vector<8x256xf32>
    %13 = arith.subf %7, %12 : vector<8x256xf32>
    %14 = math.tanh %13 : vector<8x256xf32>
    %c0_7 = arith.constant 0 : index
    %c0_8 = arith.constant 0 : index
    %c0_9 = arith.constant 0 : index
    %15 = vector.load %arg3[%c0_7, %c0_8, %c0_9] : memref<9x8x256xf32, #tpu.memory_space<vmem>>, vector<1x8x256xf32>
    %16 = vector.shape_cast %15 : vector<1x8x256xf32> to vector<8x256xf32>
    %17 = arith.mulf %14, %16 : vector<8x256xf32>
    %18 = arith.addf %10, %17 : vector<8x256xf32>
    %19 = vector.extract_strided_slice %9 {offsets = [0, 1], sizes = [8, 1], strides = [1, 1]} : vector<8x9xf32> to vector<8x1xf32>
    %20 = vector.broadcast %19 : vector<8x1xf32> to vector<8x256xf32>
    %21 = arith.subf %7, %20 : vector<8x256xf32>
    %22 = math.tanh %21 : vector<8x256xf32>
    %c1 = arith.constant 1 : index
    %c0_10 = arith.constant 0 : index
    %c0_11 = arith.constant 0 : index
    %23 = vector.load %arg3[%c1, %c0_10, %c0_11] : memref<9x8x256xf32, #tpu.memory_space<vmem>>, vector<1x8x256xf32>
    %24 = vector.shape_cast %23 : vector<1x8x256xf32> to vector<8x256xf32>
    %25 = arith.mulf %22, %24 : vector<8x256xf32>
    %26 = arith.addf %18, %25 : vector<8x256xf32>
    %27 = vector.extract_strided_slice %9 {offsets = [0, 2], sizes = [8, 1], strides = [1, 1]} : vector<8x9xf32> to vector<8x1xf32>
    %28 = vector.broadcast %27 : vector<8x1xf32> to vector<8x256xf32>
    %29 = arith.subf %7, %28 : vector<8x256xf32>
    %30 = math.tanh %29 : vector<8x256xf32>
    %c2 = arith.constant 2 : index
    %c0_12 = arith.constant 0 : index
    %c0_13 = arith.constant 0 : index
    %31 = vector.load %arg3[%c2, %c0_12, %c0_13] : memref<9x8x256xf32, #tpu.memory_space<vmem>>, vector<1x8x256xf32>
    %32 = vector.shape_cast %31 : vector<1x8x256xf32> to vector<8x256xf32>
    %33 = arith.mulf %30, %32 : vector<8x256xf32>
    %34 = arith.addf %26, %33 : vector<8x256xf32>
    %35 = vector.extract_strided_slice %9 {offsets = [0, 3], sizes = [8, 1], strides = [1, 1]} : vector<8x9xf32> to vector<8x1xf32>
    %36 = vector.broadcast %35 : vector<8x1xf32> to vector<8x256xf32>
    %37 = arith.subf %7, %36 : vector<8x256xf32>
    %38 = math.tanh %37 : vector<8x256xf32>
    %c3 = arith.constant 3 : index
    %c0_14 = arith.constant 0 : index
    %c0_15 = arith.constant 0 : index
    %39 = vector.load %arg3[%c3, %c0_14, %c0_15] : memref<9x8x256xf32, #tpu.memory_space<vmem>>, vector<1x8x256xf32>
    %40 = vector.shape_cast %39 : vector<1x8x256xf32> to vector<8x256xf32>
    %41 = arith.mulf %38, %40 : vector<8x256xf32>
    %42 = arith.addf %34, %41 : vector<8x256xf32>
    %43 = vector.extract_strided_slice %9 {offsets = [0, 4], sizes = [8, 1], strides = [1, 1]} : vector<8x9xf32> to vector<8x1xf32>
    %44 = vector.broadcast %43 : vector<8x1xf32> to vector<8x256xf32>
    %45 = arith.subf %7, %44 : vector<8x256xf32>
    %46 = math.tanh %45 : vector<8x256xf32>
    %c4 = arith.constant 4 : index
    %c0_16 = arith.constant 0 : index
    %c0_17 = arith.constant 0 : index
    %47 = vector.load %arg3[%c4, %c0_16, %c0_17] : memref<9x8x256xf32, #tpu.memory_space<vmem>>, vector<1x8x256xf32>
    %48 = vector.shape_cast %47 : vector<1x8x256xf32> to vector<8x256xf32>
    %49 = arith.mulf %46, %48 : vector<8x256xf32>
    %50 = arith.addf %42, %49 : vector<8x256xf32>
    %51 = vector.extract_strided_slice %9 {offsets = [0, 5], sizes = [8, 1], strides = [1, 1]} : vector<8x9xf32> to vector<8x1xf32>
    %52 = vector.broadcast %51 : vector<8x1xf32> to vector<8x256xf32>
    %53 = arith.subf %7, %52 : vector<8x256xf32>
    %54 = math.tanh %53 : vector<8x256xf32>
    %c5 = arith.constant 5 : index
    %c0_18 = arith.constant 0 : index
    %c0_19 = arith.constant 0 : index
    %55 = vector.load %arg3[%c5, %c0_18, %c0_19] : memref<9x8x256xf32, #tpu.memory_space<vmem>>, vector<1x8x256xf32>
    %56 = vector.shape_cast %55 : vector<1x8x256xf32> to vector<8x256xf32>
    %57 = arith.mulf %54, %56 : vector<8x256xf32>
    %58 = arith.addf %50, %57 : vector<8x256xf32>
    %59 = vector.extract_strided_slice %9 {offsets = [0, 6], sizes = [8, 1], strides = [1, 1]} : vector<8x9xf32> to vector<8x1xf32>
    %60 = vector.broadcast %59 : vector<8x1xf32> to vector<8x256xf32>
    %61 = arith.subf %7, %60 : vector<8x256xf32>
    %62 = math.tanh %61 : vector<8x256xf32>
    %c6 = arith.constant 6 : index
    %c0_20 = arith.constant 0 : index
    %c0_21 = arith.constant 0 : index
    %63 = vector.load %arg3[%c6, %c0_20, %c0_21] : memref<9x8x256xf32, #tpu.memory_space<vmem>>, vector<1x8x256xf32>
    %64 = vector.shape_cast %63 : vector<1x8x256xf32> to vector<8x256xf32>
    %65 = arith.mulf %62, %64 : vector<8x256xf32>
    %66 = arith.addf %58, %65 : vector<8x256xf32>
    %67 = vector.extract_strided_slice %9 {offsets = [0, 7], sizes = [8, 1], strides = [1, 1]} : vector<8x9xf32> to vector<8x1xf32>
    %68 = vector.broadcast %67 : vector<8x1xf32> to vector<8x256xf32>
    %69 = arith.subf %7, %68 : vector<8x256xf32>
    %70 = math.tanh %69 : vector<8x256xf32>
    %c7 = arith.constant 7 : index
    %c0_22 = arith.constant 0 : index
    %c0_23 = arith.constant 0 : index
    %71 = vector.load %arg3[%c7, %c0_22, %c0_23] : memref<9x8x256xf32, #tpu.memory_space<vmem>>, vector<1x8x256xf32>
    %72 = vector.shape_cast %71 : vector<1x8x256xf32> to vector<8x256xf32>
    %73 = arith.mulf %70, %72 : vector<8x256xf32>
    %74 = arith.addf %66, %73 : vector<8x256xf32>
    %75 = vector.extract_strided_slice %9 {offsets = [0, 8], sizes = [8, 1], strides = [1, 1]} : vector<8x9xf32> to vector<8x1xf32>
    %76 = vector.broadcast %75 : vector<8x1xf32> to vector<8x256xf32>
    %77 = arith.subf %7, %76 : vector<8x256xf32>
    %78 = math.tanh %77 : vector<8x256xf32>
    %c8 = arith.constant 8 : index
    %c0_24 = arith.constant 0 : index
    %c0_25 = arith.constant 0 : index
    %79 = vector.load %arg3[%c8, %c0_24, %c0_25] : memref<9x8x256xf32, #tpu.memory_space<vmem>>, vector<1x8x256xf32>
    %80 = vector.shape_cast %79 : vector<1x8x256xf32> to vector<8x256xf32>
    %81 = arith.mulf %78, %80 : vector<8x256xf32>
    %82 = arith.addf %74, %81 : vector<8x256xf32>
    %83 = vector.broadcast %4 : vector<8x1xf32> to vector<8x256xf32>
    %84 = arith.mulf %82, %83 : vector<8x256xf32>
    %c0_26 = arith.constant 0 : index
    %c0_27 = arith.constant 0 : index
    %85 = vector.load %arg4[%c0_26, %c0_27] : memref<8x256xf32, #tpu.memory_space<vmem>>, vector<8x256xf32>
    tpu.vector_store %arg4[%c0_26, %c0_27], %84 {strides = array<i32>} : memref<8x256xf32, #tpu.memory_space<vmem>>, vector<8x256xf32>,
    return
  }
}

</mosaic_0001>

<bundles_post_ra>
// kernel: multidiffusion_forward.1
= control target key start
LH: loop header
LB: loop body
LE: loop exit
PB: predicated region body
PF: predicated region fallthrough
CT: control target
= control target key end

     0   :  { %vm25_vm0 = vcmask 64512   ;;  %v2023_v2 = vmov 0.0   ;;  %v2903_v7 = vmov 8   ;;  %s2898_s0 = inlined_call_operand.vmem [shape: f32[8,256], index: 0, kind: input, shape index: {}]   ;;  %s2899_s1 = inlined_call_operand.vmem [shape: f32[8,10], index: 1, kind: input, shape index: {}]   ;;  %s2900_s2 = inlined_call_operand.vmem [shape: f32[256,9], index: 2, kind: input, shape index: {}]   ;;  %s2901_s3 = inlined_call_operand.vmem [shape: f32[9,8,256], index: 3, kind: input, shape index: {}]   ;;  %s2902_s4 = inlined_call_operand.vmem [shape: f32[8,256], index: 4, kind: output, shape index: {}]  }
   0x1   :  { %v18_v0 = vld [vmem:[%s2898_s0 + $0x8] sm:$0xff]  ;;  %v17_v1 = vld [vmem:[%s2898_s0] sm:$0xff]  ;;  %331 = vmatprep.mubr.f32.mxu0 %v2023_v2  ;;  %94 = vmatprep.mubr.f32.mxu1 %v2023_v2  ;;  %v2105_v16 = vld [vmem:[%s2900_s2 + $0x90] sm:$0xff] }
   0x2   :  { %v2069_v3 = vld [vmem:[%s2899_s1] sm:$0xff]  ;;  %v28_v4 = vand.u32 4294901760, %v18_v0  ;;  %v2072_v5 = vand.u32 4294901760, %v17_v1  ;;  %1975 = vset.pattern.permute.xlu0 %v2903_v7  ;;  %v2084_v9 = vld [vmem:[%s2900_s2 + $0x88] sm:$0xff]  ;;  %v2114_v20 = vld [vmem:[%s2900_s2 + $0x98] sm:$0xff]  ;;  %v580_v21 = vand.u32 4294901760, %v2105_v16 }
   0x3   :  { %2966 = vst [vmem:[#allocation2_spill] sm:$0xff] %v2069_v3  ;;  %v26_v6 = vsel %vm25_vm0, %v2069_v3, 0  ;;  %v2079_v8 = vld [vmem:[%s2900_s2 + $0x80] sm:$0xff]  ;;  %22 = vperm.xlu0 %1975, %v2069_v3   ;;  %v577_v13 = vand.u32 4294901760, %v2084_v9  ;;  %v2099_v14 = vld [vmem:[%s2900_s2 + $0x8] sm:$0xff]  ;;  %v583_v25 = vand.u32 4294901760, %v2114_v20 }
   0x4   :  { %v2089_v10 = vld [vmem:[%s2900_s2] sm:$0xff]  ;;  %v2091_v11 = vand.u32 4294901760, %v26_v6  ;;  %v574_v12 = vand.u32 4294901760, %v2079_v8  ;;  %266 = vmatprep.subr.mxu0 %v28_v4  ;;  %v2108_v17 = vsub.f32 %v17_v1, %v2072_v5  ;;  %29 = vmatprep.subr.mxu1 %v28_v4  ;;  %v107_v18 = vsub.f32 %v18_v0, %v28_v4  ;;  %v2166_v42 = vld [vmem:[%s2900_s2 + $0x10] sm:$0xff]  ;;  %v2178_v47 = vld [vmem:[%s2900_s2 + $0x18] sm:$0xff] }
   0x5   :  { %v526_v15 = vand.u32 4294901760, %v2089_v10  ;;  %v529_v19 = vand.u32 4294901760, %v2099_v14  ;;  %268 = vmatpush1.msra.mxu0 %v2072_v5  ;;  %31 = vmatpush1.msra.mxu1 %v2072_v5  ;;  %v2130_v24 = vsub.f32 %v2084_v9, %v577_v13  ;;  %v2150_v33 = vsub.f32 %v2105_v16, %v580_v21  ;;  %v2186_v52 = vld [vmem:[%s2900_s2 + $0xa0] sm:$0xff]  ;;  %v2197_v57 = vld [vmem:[%s2900_s2 + $0xa8] sm:$0xff]  ;;  %v2303_v16 = vld [vmem:[%s2900_s2 + $0x30] sm:$0xff] }
   0x6   :  { %v2119_v22 = vsub.f32 %v26_v6, %v2091_v11  ;;  %v2125_v23 = vsub.f32 %v2079_v8, %v574_v12  ;;  %v108_v26 = vand.u32 4294901760, %v107_v18  ;;  %v114_v27 = vand.u32 4294901760, %v2108_v17  ;;  %v2202_v58 = vld [vmem:[%s2900_s2 + $0x20] sm:$0xff]  ;;  %v2208_v62 = vld [vmem:[%s2900_s2 + $0x28] sm:$0xff] }
   0x7   :  { %v2137_v28 = vsub.f32 %v2089_v10, %v526_v15  ;;  %v2142_v29 = vsub.f32 %v2099_v14, %v529_v19  ;;  %v2922_v32 = vand.u32 4294901760, %v2130_v24  ;;  %v2915_v41 = vand.u32 4294901760, %v2150_v33 }
   0x8   :  { %v97_v30 = vand.u32 4294901760, %v2119_v22  ;;  %v2923_v31 = vand.u32 4294901760, %v2125_v23  ;;  %v109_v34 = vsub.f32 %v107_v18, %v108_v26  ;;  %v115_v35 = vsub.f32 %v2108_v17, %v114_v27  ;;  %344 = vmatprep.subr.mxu0 %v108_v26 }
   0x9   :  { %v2921_v36 = vand.u32 4294901760, %v2137_v28  ;;  %v2920_v37 = vand.u32 4294901760, %v2142_v29  ;;  %v760_v40 = vsub.f32 %v2130_v24, %v2922_v32  ;;  %v767_v51 = vsub.f32 %v2150_v33, %v2915_v41  ;;  %v2501_v32 = vld [vmem:[%s2900_s2 + $0x68] sm:$0xff] }
   0xa   :  { %335 = vmatmul.mubr.f32.vlgmr.msra.gmra.mrb[0].mxu0 %v97_v30  ;;  %v98_v38 = vsub.f32 %v2119_v22, %v97_v30  ;;  %v753_v39 = vsub.f32 %v2125_v23, %v2923_v31  ;;  %v110_v43 = vand.u32 4294901760, %v109_v34  ;;  %v116_v44 = vand.u32 4294901760, %v115_v35 }
   0xb   :  { %348 = vmatpush1.msra.mxu0 %v114_v27  ;;  %411 = vmatprep.mubr.f32.mxu0 %v2023_v2  ;;  %v641_v45 = vsub.f32 %v2137_v28, %v2921_v36  ;;  %v648_v46 = vsub.f32 %v2142_v29, %v2920_v37  ;;  %v761_v50 = vand.u32 4294901760, %v760_v40  ;;  %v2191_v55 = vsub.f32 %v2114_v20, %v583_v25  ;;  %v2308_v20 = vld [vmem:[%s2900_s2 + $0x38] sm:$0xff]  ;;  %v2496_v36 = vld [vmem:[%s2900_s2 + $0x60] sm:$0xff] }
   0xc   :  { %v99_v48 = vand.u32 4294901760, %v98_v38  ;;  %420 = vmatprep.subr.mxu0 %v28_v4  ;;  %v754_v49 = vand.u32 4294901760, %v753_v39  ;;  %111 = vmatprep.subr.mxu1 %v110_v43  ;;  %v532_v56 = vand.u32 4294901760, %v2166_v42  ;;  %v768_v60 = vand.u32 4294901760, %v767_v51 }
   0xd   :  { %v642_v53 = vand.u32 4294901760, %v641_v45  ;;  %v649_v54 = vand.u32 4294901760, %v648_v46  ;;  %v535_v61 = vand.u32 4294901760, %v2178_v47  ;;  %v2914_v63 = vand.u32 4294901760, %v2191_v55 }
   0xe   :  { %100 = vmatmul.mubr.f32.vlgmr.msra.gmra.mrb[0].mxu1 %v99_v48  ;;  %v1792_v59 = vpack.c.bf16 %v761_v50, %v754_v49  ;;  %v2215_v0 = vsub.f32 %v2166_v42, %v532_v56  ;;  %v2221_v1 = vpack.c.bf16 %v577_v13, %v574_v12  ;;  %v586_v4 = vand.u32 4294901760, %v2186_v52  ;;  %v2242_v13 = vld [vmem:[%s2900_s2 + $0xb0] sm:$0xff] }
   0xf   :  { %117 = vmatpush1.msra.mxu1 %v116_v44  ;;  %180 = vmatprep.mubr.f32.mxu1 %v2023_v2  ;;  %v1794_v6 = vpack.c.bf16 %v649_v54, %v642_v53  ;;  %v2225_v26 = vsub.f32 %v2178_v47, %v535_v61  ;;  %v589_v27 = vand.u32 4294901760, %v2197_v57  ;;  %v538_v30 = vand.u32 4294901760, %v2202_v58 }
  0x10   :  { %190 = vmatprep.subr.mxu1 %v107_v18  ;;  %v774_v34 = vsub.f32 %v2191_v55, %v2914_v63  ;;  %v2913_v8 = vand.u32 4294901760, %v2215_v0  ;;  %v2236_v9 = vsub.f32 %v2186_v52, %v586_v4  ;;  %v541_v12 = vand.u32 4294901760, %v2208_v62 }
  0x11   :  { %v2910_v18 = vand.u32 4294901760, %v2225_v26  ;;  %v2247_v35 = vsub.f32 %v2197_v57, %v589_v27  ;;  %v2253_v38 = vpack.c.bf16 %v529_v19, %v526_v15  ;;  %v2258_v39 = vsub.f32 %v2202_v58, %v538_v30  ;;  %v2274_v15 = vld [vmem:[%s2900_s2 + $0xb8] sm:$0xff] }
  0x12   :  { %413 = vmatmul.mubr.f32.vlgmr.msra.gmra.mrb[0].mxu0 %v2091_v11  ;;  %v775_v40 = vand.u32 4294901760, %v774_v34  ;;  %v655_v43 = vsub.f32 %v2215_v0, %v2913_v8  ;;  %v2909_v10 = vand.u32 4294901760, %v2236_v9  ;;  %v2269_v14 = vsub.f32 %v2208_v62, %v541_v12  ;;  %v2323_v34 = vld [vmem:[%s2900_s2 + $0xc0] sm:$0xff]  ;;  %v2438_v62 = vld [vmem:[%s2900_s2 + $0xd0] sm:$0xff] }
  0x13   :  { %422 = vmatpush1.msra.mxu0 %v2072_v5  ;;  %485 = vmatprep.mubr.f32.mxu0 %v2023_v2  ;;  %v662_v5 = vsub.f32 %v2225_v26, %v2910_v18  ;;  %v2907_v19 = vand.u32 4294901760, %v2247_v35  ;;  %v2906_v44 = vand.u32 4294901760, %v2258_v39  ;;  %v2940_v45 = vand.u32 4294901760, %v2242_v13 }
  0x14   :  { %1793 = vmatprep.subr.bf16.mxu0 %v1792_v59  ;;  %v656_v46 = vand.u32 4294901760, %v655_v43  ;;  %v781_v47 = vsub.f32 %v2236_v9, %v2909_v10  ;;  %v2904_v48 = vand.u32 4294901760, %v2269_v14  ;;  %v2290_v49 = vpack.c.bf16 %v583_v25, %v580_v21 }
  0x15   :  { %v663_v50 = vand.u32 4294901760, %v662_v5  ;;  %v788_v51 = vsub.f32 %v2247_v35, %v2907_v19  ;;  %v669_v53 = vsub.f32 %v2258_v39, %v2906_v44  ;;  %v2939_v54 = vand.u32 4294901760, %v2274_v15 }
  0x16   :  { %182 = vmatmul.mubr.f32.vlgmr.msra.gmra.mrb[0].mxu1 %v2091_v11  ;;  %v1796_v21 = vpack.c.bf16 %v775_v40, %v768_v60  ;;  %v782_v25 = vand.u32 4294901760, %v781_v47  ;;  %v676_v57 = vsub.f32 %v2269_v14, %v2904_v48  ;;  %v2318_v59 = vsub.f32 %v2242_v13, %v2940_v45 }
  0x17   :  { %193 = vmatpush1.msra.mxu1 %v2108_v17  ;;  %256 = vmatprep.mubr.f32.mxu1 %v2023_v2  ;;  %v789_v17 = vand.u32 4294901760, %v788_v51  ;;  %v670_v2 = vand.u32 4294901760, %v669_v53  ;;  %v2329_v60 = vsub.f32 %v2274_v15, %v2939_v54  ;;  %v2333_v40 = vpack.c.bf16 %v535_v61, %v532_v56  ;;  %v2341_v51 = vld [vmem:[%s2900_s2 + $0xc8] sm:$0xff]  ;;  %v2349_v61 = vld [vmem:[%s2900_s2 + $0x40] sm:$0xff] }
  0x18   :  { %2967 = vst [vmem:[#allocation3_spill] sm:$0xff] %v2318_v59  ;;  %1761 = vmatprep.subr.bf16.mxu1 %v2221_v1  ;;  %v677_v43 = vand.u32 4294901760, %v676_v57  ;;  %v2905_v5 = vand.u32 4294901760, %v2318_v59  ;;  %v2937_v47 = vand.u32 4294901760, %v2303_v16  ;;  %v2936_v7 = vand.u32 4294901760, %v2308_v20 }
  0x19   :  { %2968 = vst [vmem:[#allocation4_spill] sm:$0xff] %v2329_v60  ;;  %v1798_v53 = vpack.c.bf16 %v663_v50, %v656_v46  ;;  %v1800_v48 = vpack.c.bf16 %v789_v17, %v782_v25  ;;  %v2908_v42 = vand.u32 4294901760, %v2329_v60  ;;  %v2931_v56 = vand.u32 4294901760, %v2323_v34 }
  0x1a   :  { %487 = vmatmul.mubr.f32.vlgmr.msra.gmra.mrb[0].mxu0 %v2091_v11  ;;  %v795_v57 = vsub.f32 %v2318_v59, %v2905_v5  ;;  %v2357_v11 = vsub.f32 %v2303_v16, %v2937_v47  ;;  %v2362_v46 = vsub.f32 %v2308_v20, %v2936_v7  ;;  %v2366_v50 = vpack.c.bf16 %v589_v27, %v586_v4 }
  0x1b   :  { %1795 = vmatpush3.bf16.msra.mxu0 %v1794_v6  ;;  %v2371_v6 = vld [vmem:[%s2900_s2 + $0x48] sm:$0xff]  ;;  %v1802_v25 = vpack.c.bf16 %v677_v43, %v670_v2  ;;  %v802_v17 = vsub.f32 %v2329_v60, %v2908_v42  ;;  %v2930_v5 = vand.u32 4294901760, %v2341_v51  ;;  %v2380_v44 = vsub.f32 %v2323_v34, %v2931_v56 }
  0x1c   :  { %2969 = vst [vmem:[#allocation5_spill] sm:$0xff] %v2357_v11  ;;  %2970 = vst [vmem:[#allocation6_spill] sm:$0xff] %v2362_v46  ;;  %1797 = vmatprep.subr.bf16.mxu0 %v1796_v21  ;;  %v796_v52 = vand.u32 4294901760, %v795_v57  ;;  %v2911_v4 = vand.u32 4294901760, %v2357_v11  ;;  %v2912_v27 = vand.u32 4294901760, %v2362_v46  ;;  %v2929_v19 = vand.u32 4294901760, %v2349_v61 }
  0x1d   :  { %2971 = vst [vmem:[#allocation7_spill] sm:$0xff] %v2380_v44  ;;  %v803_v21 = vand.u32 4294901760, %v802_v17  ;;  %v2916_v2 = vand.u32 4294901760, %v2380_v44  ;;  %v2390_v43 = vsub.f32 %v2341_v51, %v2930_v5  ;;  %v2928_v42 = vand.u32 4294901760, %v2371_v6 }
  0x1e   :  { %259 = vmatmul.mubr.f32.vlgmr.msra.gmra.mrb[0].mxu1 %v2119_v22  ;;  %v683_v57 = vsub.f32 %v2357_v11, %v2911_v4  ;;  %v690_v22 = vsub.f32 %v2362_v46, %v2912_v27  ;;  %v2403_v17 = vsub.f32 %v2349_v61, %v2929_v19 }
  0x1f   :  { %2972 = vst [vmem:[#allocation8_spill] sm:$0xff] %v2390_v43  ;;  %1799 = vmatpush3.bf16.msra.mxu0 %v1798_v53  ;;  %1763 = vmatpush3.bf16.msra.mxu1 %v2253_v38  ;;  %v1804_v10 = vpack.c.bf16 %v803_v21, %v796_v52  ;;  %v809_v53 = vsub.f32 %v2380_v44, %v2916_v2  ;;  %v2919_v18 = vand.u32 4294901760, %v2390_v43 }
  0x20   :  { %2973 = vst [vmem:[#allocation9_spill] sm:$0xff] %v2403_v17  ;;  %1801 = vmatprep.subr.bf16.mxu0 %v1800_v48  ;;  %1765 = vmatprep.subr.bf16.mxu1 %v2290_v49  ;;  %v2413_v4 = vsub.f32 %v2371_v6, %v2928_v42  ;;  %v684_v27 = vand.u32 4294901760, %v683_v57  ;;  %v691_v8 = vand.u32 4294901760, %v690_v22  ;;  %v2918_v63 = vand.u32 4294901760, %v2403_v17 }
  0x21   :  { %v810_v41 = vand.u32 4294901760, %v809_v53  ;;  %v816_v48 = vsub.f32 %v2390_v43, %v2919_v18  ;;  %v2425_v2 = vpack.c.bf16 %v541_v12, %v538_v30  ;;  %v2443_v30 = vld [vmem:[%s2900_s2 + $0xd8] sm:$0xff]  ;;  %v2927_v12 = vand.u32 4294901760, %v2438_v62 }
  0x22   :  { %2974 = vst [vmem:[#allocation10_spill] sm:$0xff] %v2413_v4  ;;  %v2917_v52 = vand.u32 4294901760, %v2413_v4  ;;  %v1806_v21 = vpack.c.bf16 %v691_v8, %v684_v27  ;;  %v697_v57 = vsub.f32 %v2403_v17, %v2918_v63 }
  0x23   :  { %1803 = vmatpush3.bf16.msra.mxu0 %v1802_v25  ;;  %1767 = vmatpush3.bf16.msra.mxu1 %v2333_v40  ;;  %v817_v22 = vand.u32 4294901760, %v816_v48  ;;  %v2455_v48 = vld [vmem:[%s2900_s2 + $0x58] sm:$0xff] }
  0x24   :  { %1805 = vmatprep.subr.bf16.mxu0 %v1804_v10  ;;  %1769 = vmatprep.subr.bf16.mxu1 %v2366_v50  ;;  %v704_v25 = vsub.f32 %v2413_v4, %v2917_v52  ;;  %v698_v53 = vand.u32 4294901760, %v697_v57  ;;  %v2450_v10 = vld [vmem:[%s2900_s2 + $0x50] sm:$0xff]  ;;  %v2924_v57 = vand.u32 4294901760, %v2455_v48 }
  0x25   :  { %v1808_v8 = vpack.c.bf16 %v817_v22, %v810_v41  ;;  %v2926_v41 = vand.u32 4294901760, %v2443_v30  ;;  %v2462_v22 = vsub.f32 %v2438_v62, %v2927_v12  ;;  %v507_v4 = vld [vmem:[%s2900_s2 + $0x70] sm:$0xff] }
  0x26   :  { %v705_v27 = vand.u32 4294901760, %v704_v25 }
  0x27   :  { %1807 = vmatpush3.bf16.msra.mxu0 %v1806_v21  ;;  %1771 = vmatpush3.bf16.msra.mxu1 %v2425_v2  ;;  %v2925_v21 = vand.u32 4294901760, %v2450_v10  ;;  %v2467_v25 = vsub.f32 %v2443_v30, %v2926_v41  ;;  %v2932_v52 = vand.u32 4294901760, %v2462_v22  ;;  %v2944_v41 = vand.u32 4294901760, %v2501_v32 }
  0x28   :  { %1809 = vmatprep.subr.bf16.mxu0 %v1808_v8  ;;  %v1810_v58 = vpack.c.bf16 %v705_v27, %v698_v53  ;;  %v2477_v8 = vsub.f32 %v2455_v48, %v2924_v57  ;;  %v2482_v27 = vld [vmem:[%s2900_s2 + $0xe0] sm:$0xff] }
  0x29   :  { %v2472_v53 = vsub.f32 %v2450_v10, %v2925_v21  ;;  %v2933_v63 = vand.u32 4294901760, %v2467_v25  ;;  %v2934_v18 = vand.u32 4294901760, %v2482_v27  ;;  %v2943_v21 = vand.u32 4294901760, %v2496_v36 }
  0x2a   :  { %v2941_v57 = vand.u32 4294901760, %v2477_v8  ;;  %v823_v12 = vsub.f32 %v2462_v22, %v2932_v52 }
  0x2b   :  { %1811 = vmatpush3.bf16.msra.mxu0 %v1810_v58  ;;  %v2487_v58 = vld [vmem:[%s2900_s2 + $0xe8] sm:$0xff]  ;;  %v2938_v31 = vand.u32 4294901760, %v2472_v53  ;;  %v830_v42 = vsub.f32 %v2467_v25, %v2933_v63  ;;  %v2516_v19 = vsub.f32 %v2482_v27, %v2934_v18  ;;  %v2532_v63 = vsub.f32 %v2496_v36, %v2943_v21  ;;  %v523_v21 = vld [vmem:[%s2900_s2 + $0xf0] sm:$0xff] }
  0x2c   :  { %v2935_v37 = vand.u32 4294901760, %v2487_v58  ;;  %v718_v52 = vsub.f32 %v2477_v8, %v2941_v57  ;;  %v2537_v18 = vsub.f32 %v2501_v32, %v2944_v41  ;;  %v524_v41 = vld [vmem:[%s2900_s2 + $0xf8] sm:$0xff]  ;;  %v616_v46 = vand.u32 4294901760, %v523_v21 }
  0x2d   :  { %v711_v56 = vsub.f32 %v2472_v53, %v2938_v31  ;;  %v831_v7 = vand.u32 4294901760, %v830_v42  ;;  %v2975_v42 = vand.u32 4294901760, %v2242_v13  ;;  %v508_v13 = vld [vmem:[%s2900_s2 + $0x78] sm:$0xff] }
  0x2e   :  { %v2521_v5 = vsub.f32 %v2487_v58, %v2935_v37  ;;  %v824_v37 = vand.u32 4294901760, %v823_v12  ;;  %v719_v45 = vand.u32 4294901760, %v718_v52  ;;  %v2976_v12 = vand.u32 4294901760, %v2274_v15 }
  0x2f   :  { %v712_v54 = vand.u32 4294901760, %v711_v56  ;;  %v2977_v52 = vand.u32 4294901760, %v2516_v19  ;;  %v2978_v15 = vand.u32 4294901760, %v2303_v16  ;;  %v619_v16 = vand.u32 4294901760, %v524_v41 }
  0x30   :  { %v2947_v31 = vand.u32 4294901760, %v2521_v5  ;;  %v2553_v47 = vpack.c.bf16 %v2976_v12, %v2975_v42  ;;  %v1812_v56 = vpack.c.bf16 %v831_v7, %v824_v37  ;;  %v2979_v7 = vand.u32 4294901760, %v2308_v20 }
  0x31   :  { %v837_v57 = vsub.f32 %v2516_v19, %v2977_v52  ;;  %v1814_v42 = vpack.c.bf16 %v719_v45, %v712_v54  ;;  %v2980_v12 = vand.u32 4294901760, %v2532_v63  ;;  %v568_v54 = vand.u32 4294901760, %v507_v4 }
  0x32   :  { %v844_v3 = vsub.f32 %v2521_v5, %v2947_v31  ;;  %v2571_v37 = vpack.c.bf16 %v2979_v7, %v2978_v15  ;;  %v2981_v31 = vand.u32 4294901760, %v2537_v18  ;;  %1773 = vmatprep.subr.bf16.mxu1 %v2553_v47  ;;  %1813 = vmatprep.subr.bf16.mxu0 %v1812_v56  ;;  %v571_v15 = vand.u32 4294901760, %v508_v13 }
  0x33   :  { %v725_v52 = vsub.f32 %v2532_v63, %v2980_v12  ;;  %v838_v43 = vand.u32 4294901760, %v837_v57  ;;  %1815 = vmatpush3.bf16.msra.mxu0 %v1814_v42  ;;  %v2982_v7 = vand.u32 4294901760, %v2323_v34  ;;  %v2983_v12 = vand.u32 4294901760, %v2341_v51 }
  0x34   :  { %v732_v17 = vsub.f32 %v2537_v18, %v2981_v31  ;;  %v845_v44 = vand.u32 4294901760, %v844_v3  ;;  %1775 = vmatpush3.bf16.msra.mxu1 %v2571_v37  ;;  %v2587_v60 = vsub.f32 %v523_v21, %v616_v46  ;;  %v2589_v57 = vsub.f32 %v524_v41, %v619_v16 }
  0x35   :  { %v726_v20 = vand.u32 4294901760, %v725_v52  ;;  %v2585_v11 = vpack.c.bf16 %v2983_v12, %v2982_v7  ;;  %v2984_v3 = vand.u32 4294901760, %v2349_v61  ;;  %v2985_v56 = vand.u32 4294901760, %v2371_v6 }
  0x36   :  { %v733_v45 = vand.u32 4294901760, %v732_v17  ;;  %v1816_v31 = vpack.c.bf16 %v845_v44, %v838_v43  ;;  %v2597_v52 = vsub.f32 %v507_v4, %v568_v54  ;;  %v2599_v59 = vsub.f32 %v508_v13, %v571_v15 }
  0x37   :  { %v2595_v42 = vpack.c.bf16 %v2985_v56, %v2984_v3  ;;  %1777 = vmatprep.subr.bf16.mxu1 %v2585_v11  ;;  %v2965_v44 = vand.u32 4294901760, %v2587_v60  ;;  %v2964_v34 = vand.u32 4294901760, %v2589_v57  ;;  %v2986_v6 = vand.u32 4294901760, %v2438_v62 }
  0x38   :  { %v1818_v17 = vpack.c.bf16 %v733_v45, %v726_v20  ;;  %1817 = vmatprep.subr.bf16.mxu0 %v1816_v31  ;;  %v2963_v51 = vand.u32 4294901760, %v2597_v52  ;;  %v2962_v61 = vand.u32 4294901760, %v2599_v59  ;;  %v2987_v4 = vand.u32 4294901760, %v2443_v30 }
  0x39   :  { %1779 = vmatpush3.bf16.msra.mxu1 %v2595_v42  ;;  %v851_v41 = vsub.f32 %v2587_v60, %v2965_v44  ;;  %v858_v21 = vsub.f32 %v2589_v57, %v2964_v34  ;;  %v2988_v13 = vand.u32 4294901760, %v2450_v10  ;;  %v2989_v20 = vand.u32 4294901760, %v2455_v48  ;;  %v3001_v44 = vld [vmem:[#allocation10_spill] sm:$0xff] }
  0x3a   :  { %1819 = vmatpush3.bf16.msra.mxu0 %v1818_v17  ;;  %v2611_v43 = vpack.c.bf16 %v2987_v4, %v2986_v6  ;;  %v739_v62 = vsub.f32 %v2597_v52, %v2963_v51  ;;  %v746_v30 = vsub.f32 %v2599_v59, %v2962_v61  ;;  %v2990_v31 = vand.u32 4294901760, %v2482_v27  ;;  %v2999_v51 = vld [vmem:[#allocation8_spill] sm:$0xff] }
  0x3b   :  { %v2623_v45 = vpack.c.bf16 %v2989_v20, %v2988_v13  ;;  %v852_v7 = vand.u32 4294901760, %v851_v41  ;;  %v859_v12 = vand.u32 4294901760, %v858_v21  ;;  %v2991_v10 = vand.u32 4294901760, %v2487_v58 }
  0x3c   :  { %1781 = vmatprep.subr.bf16.mxu1 %v2611_v43  ;;  %v740_v48 = vand.u32 4294901760, %v739_v62  ;;  %v747_v56 = vand.u32 4294901760, %v746_v30  ;;  %v2992_v4 = vand.u32 4294901760, %v2496_v36  ;;  %v2993_v13 = vand.u32 4294901760, %v2501_v32 }
  0x3d   :  { %v2636_v3 = vpack.c.bf16 %v2991_v10, %v2990_v31  ;;  %1783 = vmatpush3.bf16.msra.mxu1 %v2623_v45  ;;  %v1820_v17 = vpack.c.bf16 %v859_v12, %v852_v7  ;;  %v2648_v27 = vpack.c.bf16 %v619_v16, %v616_v46  ;;  %v2651_v58 = vpack.c.bf16 %v571_v15, %v568_v54 }
  0x3e   :  { %v1822_v6 = vpack.c.bf16 %v747_v56, %v740_v48  ;;  %v2644_v41 = vpack.c.bf16 %v2993_v13, %v2992_v4  ;;  %v1824_v36 = vpack.c.bf16 %v2130_v24, %v2125_v23  ;;  %v1844_v32 = vpack.c.bf16 %v2467_v25, %v2462_v22 }
  0x3f   :  { %1785 = vmatprep.subr.bf16.mxu1 %v2636_v3  ;;  %1821 = vmatprep.subr.bf16.mxu0 %v1820_v17  ;;  %v1846_v21 = vpack.c.bf16 %v2477_v8, %v2472_v53  ;;  %v1848_v46 = vpack.c.bf16 %v2521_v5, %v2516_v19  ;;  %v1850_v16 = vpack.c.bf16 %v2537_v18, %v2532_v63 }
  0x40   :  { %1823 = vmatpush3.bf16.msra.mxu0 %v1822_v6  ;;  %v1852_v54 = vpack.c.bf16 %v2589_v57, %v2587_v60 }
  0x41   :  { %1787 = vmatpush3.bf16.msra.mxu1 %v2644_v41  ;;  %1857 = vmatprep.subr.bf16.mxu0 %v2221_v1 }
  0x42   :  { %1789 = vmatprep.subr.bf16.mxu1 %v2648_v27 }
  0x45   :  { %1791 = vmatpush3.bf16.msra.mxu1 %v2651_v58 }
  0x46   :  { %1825 = vmatprep.subr.bf16.mxu1 %v1824_v36 }
  0x82   :  { %v23_v30 = vpop.permute.xlu0 %22 }
  0xed   :  { %v488_v20 = vpop.f32.mrb[0].mxu0 }
  0xee   :  { %v490_v62 = vpop.f32.mrb[1].mxu0 }
  0xf1   :  { %v260_v7 = vpop.f32.mrb[0].mxu1 }
  0xf2   :  { %v1952_v12 = vadd.f32 %v260_v7, %v23_v30  ;;  %v262_v31 = vpop.f32.mrb[1].mxu1 }
  0xf3   :  { %v1954_v10 = vadd.f32 %v262_v31, %v23_v30 }
  0xf4   :  { %v2668_v48 = vadd.f32 %v1952_v12, %v488_v20  ;;  %v1826_v12 = vpack.c.bf16 %v2142_v29, %v2137_v28 }
  0xf5   :  { %v2670_v56 = vadd.f32 %v1954_v10, %v490_v62  ;;  %v1828_v10 = vpack.c.bf16 %v2191_v55, %v2150_v33 }
  0xf6   :  { %v2673_v17 = vand.u32 4294901760, %v2668_v48 }
  0xf7   :  { %v2676_v6 = vand.u32 4294901760, %v2670_v56 }
  0xf8   :  { %v2680_v4 = vsub.f32 %v2668_v48, %v2673_v17 }
  0xf9   :  { %862 = vmatprep.mubr.f32.mxu0 %v2676_v6  ;;  %v622_v13 = vsub.f32 %v2670_v56, %v2676_v6 }
  0xfa   :  { %864 = vmatmul.mubr.f32.vlgmr.msra.gmra.mrb[2].mxu0 %v2673_v17  ;;  %v629_v36 = vand.u32 4294901760, %v2680_v4 }
  0xfb   :  { %1859 = vmatpush3.bf16.msra.mxu0 %v2253_v38  ;;  %v623_v20 = vand.u32 4294901760, %v622_v13 }
  0xfc   :  { %1861 = vmatprep.subr.bf16.mxu0 %v2290_v49  ;;  %v630_v62 = vsub.f32 %v2680_v4, %v629_v36 }
  0xfd   :  { %1106 = vmatprep.mubr.f32.mxu0 %v623_v20  ;;  %v624_v30 = vsub.f32 %v622_v13, %v623_v20  ;;  %v1830_v20 = vpack.c.bf16 %v2225_v26, %v2215_v0 }
  0xfe   :  { %v631_v31 = vand.u32 4294901760, %v630_v62  ;;  %v1834_v62 = vpack.c.bf16 %v2269_v14, %v2258_v39 }
  0xff   :  { %1863 = vmatpush3.bf16.msra.mxu0 %v2333_v40  ;;  %v625_v7 = vand.u32 4294901760, %v624_v30  ;;  %v1832_v30 = vpack.c.bf16 %v2247_v35, %v2236_v9 }
 0x100   :  { %1865 = vmatprep.subr.bf16.mxu0 %v2366_v50 }
 0x101   :  { %626 = vmatprep.mubr.f32.mxu1 %v625_v7  ;;  %v2994_v7 = vld [vmem:[#allocation3_spill] sm:$0xff] }
 0x102   :  { %632 = vmatmul.mubr.f32.vlgmr.msra.gmra.mrb[2].mxu1 %v631_v31 }
 0x103   :  { %1827 = vmatpush3.bf16.msra.mxu1 %v1826_v12  ;;  %1867 = vmatpush3.bf16.msra.mxu0 %v2425_v2  ;;  %v2995_v12 = vld [vmem:[#allocation4_spill] sm:$0xff] }
 0x104   :  { %999 = vmatprep.mubr.f32.mxu1 %v622_v13  ;;  %1829 = vmatprep.subr.bf16.mxu1 %v1828_v10  ;;  %v1836_v31 = vpack.c.bf16 %v2995_v12, %v2994_v7  ;;  %v2996_v13 = vld [vmem:[#allocation5_spill] sm:$0xff]  ;;  %v2997_v10 = vld [vmem:[#allocation6_spill] sm:$0xff] }
 0x105   :  { %1869 = vmatprep.subr.bf16.mxu0 %v2553_v47  ;;  %v1838_v61 = vpack.c.bf16 %v2997_v10, %v2996_v13 }
 0x107   :  { %1831 = vmatpush3.bf16.msra.mxu1 %v1830_v20  ;;  %1871 = vmatpush3.bf16.msra.mxu0 %v2571_v37  ;;  %v2998_v20 = vld [vmem:[#allocation7_spill] sm:$0xff] }
 0x108   :  { %1833 = vmatprep.subr.bf16.mxu1 %v1832_v30  ;;  %1873 = vmatprep.subr.bf16.mxu0 %v2585_v11  ;;  %v1840_v34 = vpack.c.bf16 %v2999_v51, %v2998_v20  ;;  %v3000_v30 = vld [vmem:[#allocation9_spill] sm:$0xff] }
 0x109   :  { %v1842_v15 = vpack.c.bf16 %v3001_v44, %v3000_v30 }
 0x10b   :  { %1835 = vmatpush3.bf16.msra.mxu1 %v1834_v62  ;;  %1875 = vmatpush3.bf16.msra.mxu0 %v2595_v42 }
 0x10c   :  { %1837 = vmatprep.subr.bf16.mxu1 %v1836_v31  ;;  %1877 = vmatprep.subr.bf16.mxu0 %v2611_v43 }
 0x10f   :  { %1839 = vmatpush3.bf16.msra.mxu1 %v1838_v61  ;;  %1879 = vmatpush3.bf16.msra.mxu0 %v2623_v45  ;;  %v3003_v61 = vand.u32 4294901760, %v2130_v24  ;;  %v3008_v24 = vand.u32 4294901760, %v2191_v55  ;;  %v3013_v55 = vand.u32 4294901760, %v2258_v39  ;;  %v3019_v39 = vand.u32 4294901760, %v2998_v20 }
 0x110   :  { %1841 = vmatprep.subr.bf16.mxu1 %v1840_v34  ;;  %1881 = vmatprep.subr.bf16.mxu0 %v2636_v3  ;;  %v3002_v34 = vand.u32 4294901760, %v2125_v23  ;;  %v3007_v23 = vand.u32 4294901760, %v2150_v33  ;;  %v3012_v33 = vand.u32 4294901760, %v2247_v35  ;;  %v3018_v35 = vand.u32 4294901760, %v2997_v10 }
 0x113   :  { %1843 = vmatpush3.bf16.msra.mxu1 %v1842_v15  ;;  %1883 = vmatpush3.bf16.msra.mxu0 %v2644_v41 }
 0x114   :  { %1845 = vmatprep.subr.bf16.mxu1 %v1844_v32  ;;  %1885 = vmatprep.subr.bf16.mxu0 %v2648_v27  ;;  %v1888_v32 = vpack.c.bf16 %v3003_v61, %v3002_v34 }
 0x117   :  { %1847 = vmatpush3.bf16.msra.mxu1 %v1846_v21  ;;  %1887 = vmatpush3.bf16.msra.mxu0 %v2651_v58  ;;  %v3006_v21 = vand.u32 4294901760, %v2142_v29  ;;  %v3011_v29 = vand.u32 4294901760, %v2236_v9  ;;  %v3017_v9 = vand.u32 4294901760, %v2996_v13 }
 0x118   :  { %1849 = vmatprep.subr.bf16.mxu1 %v1848_v46  ;;  %1921 = vmatprep.subr.bf16.mxu0 %v2221_v1  ;;  %v3004_v1 = vpack.c.bf16 %v2599_v59, %v2597_v52 }
 0x11a   :  { %1110 = vmatmul.mubr.f32.vlgmr.msra.gmra.mrb[4].mxu0 %v629_v36  ;;  %v3023_v36 = vand.u32 4294901760, %v2462_v22  ;;  %v3029_v22 = vand.u32 4294901760, %v2532_v63  ;;  %v2025_v63 = vmov 1  }
 0x11b   :  { %1851 = vmatpush3.bf16.msra.mxu1 %v1850_v16  ;;  %1923 = vmatpush3.bf16.msra.mxu0 %v2253_v38  ;;  %v3005_v38 = vand.u32 4294901760, %v2137_v28  ;;  %v1892_v16 = vpack.c.bf16 %v3008_v24, %v3007_v23  ;;  %v3010_v28 = vand.u32 4294901760, %v2225_v26  ;;  %v3016_v26 = vand.u32 4294901760, %v2995_v12 }
 0x11c   :  { %1380 = vmatprep.mubr.f32.mxu0 %v2676_v6  ;;  %1853 = vmatprep.subr.bf16.mxu1 %v1852_v54  ;;  %v3014_v54 = vand.u32 4294901760, %v2269_v14  ;;  %v3020_v14 = vand.u32 4294901760, %v2999_v51  ;;  %v3025_v51 = vand.u32 4294901760, %v2472_v53  ;;  %v3031_v53 = vand.u32 4294901760, %v2587_v60 }
 0x11d   :  { %1925 = vmatprep.subr.bf16.mxu0 %v2290_v49  ;;  %v1890_v46 = vpack.c.bf16 %v3006_v21, %v3005_v38  ;;  %v3009_v49 = vand.u32 4294901760, %v2215_v0  ;;  %v3015_v0 = vand.u32 4294901760, %v2994_v7  ;;  %1977 = vset.pattern.permute.xlu1 %v2025_v63 }
 0x11e   :  { %v1898_v15 = vpack.c.bf16 %v3014_v54, %v3013_v55  ;;  %v2031_v55 = vmov 5   ;;  %v2032_v54 = vmov 9  }
 0x11f   :  { %1855 = vmatpush3.bf16.msra.mxu1 %v3004_v1  ;;  %1927 = vmatpush3.bf16.msra.mxu0 %v2333_v40  ;;  %v1894_v40 = vpack.c.bf16 %v3010_v28, %v3009_v49 }
 0x120   :  { %1889 = vmatprep.subr.bf16.mxu1 %v1888_v32  ;;  %1929 = vmatprep.subr.bf16.mxu0 %v2366_v50  ;;  %v1896_v50 = vpack.c.bf16 %v3012_v33, %v3011_v29  ;;  %v2028_v29 = vmov 4   ;;  %v2029_v33 = vmov 3  }
 0x122   :  { %1002 = vmatmul.mubr.f32.vlgmr.msra.gmra.mrb[4].mxu1 %v2680_v4 }
 0x123   :  { %1891 = vmatpush3.bf16.msra.mxu1 %v1890_v46  ;;  %1276 = vmatprep.mubr.f32.mxu1 %v2676_v6  ;;  %v3021_v6 = vand.u32 4294901760, %v3000_v30 }
 0x124   :  { %1931 = vmatpush3.bf16.msra.mxu0 %v2425_v2  ;;  %1893 = vmatprep.subr.bf16.mxu1 %v1892_v16  ;;  %v1900_v2 = vpack.c.bf16 %v3016_v26, %v3015_v0  ;;  %v3035_v0 = vmov 8   ;;  %v3036_v26 = vld [vmem:[#allocation2_spill] sm:$0xff] }
 0x125   :  { %1933 = vmatprep.subr.bf16.mxu0 %v2553_v47  ;;  %v1902_v47 = vpack.c.bf16 %v3018_v35, %v3017_v9 }
 0x127   :  { %1895 = vmatpush3.bf16.msra.mxu1 %v1894_v40  ;;  %v2027_v40 = vmov 2  }
 0x128   :  { %1935 = vmatpush3.bf16.msra.mxu0 %v2571_v37  ;;  %1897 = vmatprep.subr.bf16.mxu1 %v1896_v50  ;;  %v1904_v37 = vpack.c.bf16 %v3020_v14, %v3019_v39  ;;  %v2030_v50 = vmov 7  }
 0x129   :  { %1937 = vmatprep.subr.bf16.mxu0 %v2585_v11  ;;  %v3022_v11 = vand.u32 4294901760, %v3001_v44  ;;  %v3027_v44 = vand.u32 4294901760, %v2516_v19  ;;  %v3033_v19 = vand.u32 4294901760, %v2597_v52 }
 0x12b   :  { %1899 = vmatpush3.bf16.msra.mxu1 %v1898_v15  ;;  %v1906_v4 = vpack.c.bf16 %v3022_v11, %v3021_v6  ;;  %v2033_v15 = vmov 6  }
 0x12c   :  { %1939 = vmatpush3.bf16.msra.mxu0 %v2595_v42  ;;  %1901 = vmatprep.subr.bf16.mxu1 %v1900_v2  ;;  %v3024_v42 = vand.u32 4294901760, %v2467_v25  ;;  %v3030_v25 = vand.u32 4294901760, %v2537_v18  ;;  %v2026_v18 = vmov 0  }
 0x12d   :  { %1941 = vmatprep.subr.bf16.mxu0 %v2611_v43  ;;  %v3026_v43 = vand.u32 4294901760, %v2477_v8  ;;  %v3032_v8 = vand.u32 4294901760, %v2589_v57  ;;  %1976 = vset.pattern.permute.xlu0 %v2026_v18 }
 0x12e   :  { %v1908_v62 = vpack.c.bf16 %v3024_v42, %v3023_v36 }
 0x12f   :  { %1903 = vmatpush3.bf16.msra.mxu1 %v1902_v47  ;;  %v1910_v7 = vpack.c.bf16 %v3026_v43, %v3025_v51 }
 0x130   :  { %1943 = vmatpush3.bf16.msra.mxu0 %v2623_v45  ;;  %1905 = vmatprep.subr.bf16.mxu1 %v1904_v37  ;;  %v3028_v45 = vand.u32 4294901760, %v2521_v5  ;;  %v3034_v5 = vand.u32 4294901760, %v2599_v59 }
 0x131   :  { %1945 = vmatprep.subr.bf16.mxu0 %v2636_v3  ;;  %v1914_v3 = vpack.c.bf16 %v3030_v25, %v3029_v22  ;;  %v1534_v22 = vld [vmem:[%s2901_s3 + $0x10] sm:$0xff]  ;;  %v1396_v25 = vld [vmem:[%s2901_s3] sm:$0xff] }
 0x132   :  { %v1912_v12 = vpack.c.bf16 %v3028_v45, %v3027_v44 }
 0x133   :  { %1907 = vmatpush3.bf16.msra.mxu1 %v1906_v4 }
 0x134   :  { %1947 = vmatpush3.bf16.msra.mxu0 %v2644_v41  ;;  %1909 = vmatprep.subr.bf16.mxu1 %v1908_v62  ;;  %v1916_v41 = vpack.c.bf16 %v3032_v8, %v3031_v53  ;;  %v1535_v8 = vld [vmem:[%s2901_s3 + $0x18] sm:$0xff] }
 0x135   :  { %1949 = vmatprep.subr.bf16.mxu0 %v2648_v27  ;;  %v1918_v27 = vpack.c.bf16 %v3034_v5, %v3033_v19 }
 0x137   :  { %1911 = vmatpush3.bf16.msra.mxu1 %v1910_v7 }
 0x138   :  { %1951 = vmatpush3.bf16.msra.mxu0 %v2651_v58  ;;  %1913 = vmatprep.subr.bf16.mxu1 %v1912_v12 }
 0x13b   :  { %1382 = vmatmul.mubr.f32.vlgmr.msra.gmra.mrb[6].mxu0 %v2673_v17  ;;  %1915 = vmatpush3.bf16.msra.mxu1 %v1914_v3 }
 0x13c   :  { %1917 = vmatprep.subr.bf16.mxu1 %v1916_v41  ;;  %v1397_v41 = vld [vmem:[%s2901_s3 + $0x8] sm:$0xff] }
 0x13f   :  { %1919 = vmatpush3.bf16.msra.mxu1 %v1918_v27  ;;  %v1536_v27 = vld [vmem:[%s2901_s3 + $0x20] sm:$0xff] }
 0x142   :  { %1278 = vmatmul.mubr.f32.vlgmr.msra.gmra.mrb[6].mxu1 %v2673_v17 }
 0x1cd   :  { %v1617_v60 = vpop.f32.mrb[2].mxu0 }
 0x1ce   :  { %v1618_v58 = vpop.f32.mrb[3].mxu0 }
 0x1cf   :  { %v1619_v57 = vadd.f32 %v1618_v58, %v1617_v60 }
 0x1d5   :  { %v1582_v31 = vpop.f32.mrb[2].mxu1 }
 0x1d6   :  { %v1583_v13 = vpop.f32.mrb[3].mxu1 }
 0x1d7   :  { %v1584_v10 = vadd.f32 %v1583_v13, %v1582_v31 }
 0x1d9   :  { %v866_v20 = vadd.f32 %v1619_v57, %v1584_v10  ;;  %v1537_v57 = vld [vmem:[%s2901_s3 + $0x28] sm:$0xff] }
 0x1ed   :  { %v1687_v30 = vpop.f32.mrb[4].mxu0 }
 0x1ee   :  { %v1688_v52 = vpop.f32.mrb[5].mxu0 }
 0x1ef   :  { %v1689_v34 = vadd.f32 %v1688_v52, %v1687_v30 }
 0x1f5   :  { %v1652_v59 = vpop.f32.mrb[4].mxu1 }
 0x1f6   :  { %v1653_v61 = vpop.f32.mrb[5].mxu1 }
 0x1f7   :  { %v1654_v32 = vadd.f32 %v1653_v61, %v1652_v59  ;;  %v1538_v59 = vld [vmem:[%s2901_s3 + $0x30] sm:$0xff] }
 0x1f9   :  { %v1004_v1 = vadd.f32 %v1654_v32, %v866_v20 }
 0x1fb   :  { %v1112_v38 = vadd.f32 %v1689_v34, %v1004_v1 }
 0x20e   :  { %v1757_v17 = vpop.f32.mrb[6].mxu0 }
 0x20f   :  { %v1758_v21 = vpop.f32.mrb[7].mxu0 }
 0x210   :  { %v1759_v46 = vadd.f32 %v1758_v21, %v1757_v17 }
 0x215   :  { %v1722_v23 = vpop.f32.mrb[6].mxu1 }
 0x216   :  { %v1723_v24 = vpop.f32.mrb[7].mxu1 }
 0x217   :  { %v1724_v16 = vadd.f32 %v1723_v24, %v1722_v23 }
 0x219   :  { %v1280_v49 = vadd.f32 %v1724_v16, %v1112_v38  ;;  %v1539_v38 = vld [vmem:[%s2901_s3 + $0x38] sm:$0xff] }
 0x21b   :  { %v1384_v28 = vadd.f32 %v1759_v46, %v1280_v49 }
 0x21d   :  { %1403 = vperm.xlu1 %1977, %v1384_v28   ;;  %1389 = vperm.xlu0 %1976, %v1384_v28  }
 0x221   :  { %1978 = vset.pattern.permute.xlu1 %v2027_v40  ;;  %1980 = vset.pattern.permute.xlu0 %v2028_v29  ;;  %v1540_v40 = vld [vmem:[%s2901_s3 + $0x40] sm:$0xff] }
 0x222   :  { %1418 = vperm.xlu1 %1978, %v1384_v28   ;;  %1448 = vperm.xlu0 %1980, %v1384_v28  }
 0x226   :  { %1979 = vset.pattern.permute.xlu1 %v2029_v33  ;;  %1983 = vset.pattern.permute.xlu0 %v2030_v50 }
 0x227   :  { %1433 = vperm.xlu1 %1979, %v1384_v28   ;;  %1493 = vperm.xlu0 %1983, %v1384_v28  }
 0x22b   :  { %1981 = vset.pattern.permute.xlu1 %v2031_v55  ;;  %1986 = vset.pattern.permute.xlu0 %v2032_v54 }
 0x22c   :  { %1463 = vperm.xlu1 %1981, %v1384_v28  }
 0x230   :  { %1982 = vset.pattern.permute.xlu1 %v2033_v15 }
 0x231   :  { %1478 = vperm.xlu1 %1982, %v1384_v28  }
 0x235   :  { %1984 = vset.pattern.permute.xlu1 %v3035_v0  ;;  %v1542_v0 = vld [vmem:[%s2901_s3 + $0x50] sm:$0xff] }
 0x236   :  { %1508 = vperm.xlu1 %1984, %v1384_v28  }
 0x23a   :  { %1985 = vset.pattern.permute.xlu1 %v2032_v54  ;;  %v1541_v54 = vld [vmem:[%s2901_s3 + $0x48] sm:$0xff] }
 0x23b   :  { %1523 = vperm.xlu1 %1985, %v3036_v26  }
 0x29c   :  { %v1404_v2 = vpop.permute.xlu1 %1403  ;;  %v1390_v9 = vpop.permute.xlu0 %1389 }
 0x29d   :  { %v1406_v35 = vsub.f32 %v2668_v48, %v1404_v2  ;;  %v1407_v47 = vsub.f32 %v2670_v56, %v1404_v2  ;;  %v1392_v39 = vsub.f32 %v2668_v48, %v1390_v9  ;;  %v1393_v14 = vsub.f32 %v2670_v56, %v1390_v9  ;;  %v1543_v9 = vld [vmem:[%s2901_s3 + $0x58] sm:$0xff] }
 0x29f   :  { %1987 = vtanh.f32 %v1406_v35 }
 0x2a0   :  { %1989 = vtanh.f32 %v1407_v47 }
 0x2a1   :  { %1991 = vtanh.f32 %v1392_v39  ;;  %v1419_v37 = vpop.permute.xlu1 %1418  ;;  %v1449_v4 = vpop.permute.xlu0 %1448 }
 0x2a2   :  { %1993 = vtanh.f32 %v1393_v14  ;;  %v1421_v6 = vsub.f32 %v2668_v48, %v1419_v37  ;;  %v1422_v11 = vsub.f32 %v2670_v56, %v1419_v37  ;;  %v1451_v42 = vsub.f32 %v2668_v48, %v1449_v4 }
 0x2a3   :  { %v1452_v43 = vsub.f32 %v2670_v56, %v1449_v4 }
 0x2a4   :  { %1995 = vtanh.f32 %v1421_v6  ;;  %v1544_v6 = vld [vmem:[%s2901_s3 + $0x60] sm:$0xff] }
 0x2a5   :  { %1997 = vtanh.f32 %v1422_v11 }
 0x2a6   :  { %v1434_v36 = vpop.permute.xlu1 %1433  ;;  %v1494_v45 = vpop.permute.xlu0 %1493 }
 0x2a7   :  { %v1436_v62 = vsub.f32 %v2668_v48, %v1434_v36  ;;  %v1437_v51 = vsub.f32 %v2670_v56, %v1434_v36  ;;  %v1496_v63 = vsub.f32 %v2668_v48, %v1494_v45  ;;  %v1497_v31 = vsub.f32 %v2670_v56, %v1494_v45  ;;  %v1545_v36 = vld [vmem:[%s2901_s3 + $0x68] sm:$0xff] }
 0x2a9   :  { %v1988_v7 = vpop.eup %1987  ;;  %1999 = vtanh.f32 %v1436_v62  ;;  %v1546_v62 = vld [vmem:[%s2901_s3 + $0x70] sm:$0xff] }
 0x2aa   :  { %v1990_v44 = vpop.eup %1989  ;;  %2001 = vtanh.f32 %v1437_v51  ;;  %v1413_v60 = vmul.f32 %v1988_v7, %v1534_v22  ;;  %v1547_v7 = vld [vmem:[%s2901_s3 + $0x78] sm:$0xff]  ;;  %v1548_v22 = vld [vmem:[%s2901_s3 + $0x80] sm:$0xff] }
 0x2ab   :  { %v1992_v12 = vpop.eup %1991  ;;  %2003 = vtanh.f32 %v1451_v42  ;;  %v1464_v3 = vpop.permute.xlu1 %1463  ;;  %v1414_v10 = vmul.f32 %v1990_v44, %v1535_v8 }
 0x2ac   :  { %v1994_v53 = vpop.eup %1993  ;;  %2005 = vtanh.f32 %v1452_v43  ;;  %v1466_v19 = vsub.f32 %v2668_v48, %v1464_v3  ;;  %v1467_v5 = vsub.f32 %v2670_v56, %v1464_v3  ;;  %v1398_v58 = vmul.f32 %v1992_v12, %v1396_v25 }
 0x2ad   :  { %v1399_v20 = vmul.f32 %v1994_v53, %v1397_v41  ;;  %v1549_v53 = vld [vmem:[%s2901_s3 + $0x88] sm:$0xff] }
 0x2ae   :  { %v1996_v18 = vpop.eup %1995  ;;  %2007 = vtanh.f32 %v1466_v19  ;;  %v1415_v1 = vadd.f32 %v1413_v60, %v1398_v58 }
 0x2af   :  { %v1998_v13 = vpop.eup %1997  ;;  %2009 = vtanh.f32 %v1467_v5  ;;  %v1428_v30 = vmul.f32 %v1996_v18, %v1536_v27  ;;  %v1416_v21 = vadd.f32 %v1414_v10, %v1399_v20 }
 0x2b0   :  { %v1479_v52 = vpop.permute.xlu1 %1478  ;;  %v1429_v34 = vmul.f32 %v1998_v13, %v1537_v57  ;;  %2011 = vtanh.f32 %v1496_v63 }
 0x2b1   :  { %v1481_v61 = vsub.f32 %v2668_v48, %v1479_v52  ;;  %v1482_v32 = vsub.f32 %v2670_v56, %v1479_v52  ;;  %2013 = vtanh.f32 %v1497_v31  ;;  %v1430_v24 = vadd.f32 %v1428_v30, %v1415_v1 }
 0x2b2   :  { %v1431_v29 = vadd.f32 %v1429_v34, %v1416_v21 }
 0x2b3   :  { %v2000_v17 = vpop.eup %1999  ;;  %2015 = vtanh.f32 %v1481_v61 }
 0x2b4   :  { %v2002_v46 = vpop.eup %2001  ;;  %v1443_v23 = vmul.f32 %v2000_v17, %v1538_v59  ;;  %2017 = vtanh.f32 %v1482_v32 }
 0x2b5   :  { %v2004_v16 = vpop.eup %2003  ;;  %v1444_v49 = vmul.f32 %v2002_v46, %v1539_v38  ;;  %v1509_v28 = vpop.permute.xlu1 %1508 }
 0x2b6   :  { %v2006_v33 = vpop.eup %2005  ;;  %v1511_v50 = vsub.f32 %v2668_v48, %v1509_v28  ;;  %v1512_v55 = vsub.f32 %v2670_v56, %v1509_v28  ;;  %v1445_v15 = vadd.f32 %v1443_v23, %v1430_v24  ;;  %v1458_v35 = vmul.f32 %v2004_v16, %v1540_v40 }
 0x2b7   :  { %v1446_v26 = vadd.f32 %v1444_v49, %v1431_v29  ;;  %v1459_v56 = vmul.f32 %v2006_v33, %v1541_v54 }
 0x2b8   :  { %v2008_v2 = vpop.eup %2007  ;;  %2019 = vtanh.f32 %v1511_v50  ;;  %v1460_v39 = vadd.f32 %v1458_v35, %v1445_v15 }
 0x2b9   :  { %v2010_v48 = vpop.eup %2009  ;;  %2021 = vtanh.f32 %v1512_v55  ;;  %v1473_v47 = vmul.f32 %v2008_v2, %v1542_v0  ;;  %v1461_v11 = vadd.f32 %v1459_v56, %v1446_v26 }
 0x2ba   :  { %v2012_v14 = vpop.eup %2011  ;;  %v1474_v37 = vmul.f32 %v2010_v48, %v1543_v9  ;;  %v1524_v58 = vpop.permute.xlu1 %1523 }
 0x2bb   :  { %v2014_v4 = vpop.eup %2013  ;;  %v1475_v44 = vadd.f32 %v1473_v47, %v1460_v39  ;;  %v1503_v3 = vmul.f32 %v2012_v14, %v1546_v62 }
 0x2bc   :  { %v1476_v12 = vadd.f32 %v1474_v37, %v1461_v11  ;;  %v1504_v41 = vmul.f32 %v2014_v4, %v1547_v7 }
 0x2bd   :  { %v2016_v42 = vpop.eup %2015 }
 0x2be   :  { %v2018_v51 = vpop.eup %2017  ;;  %v1488_v43 = vmul.f32 %v2016_v42, %v1544_v6 }
 0x2bf   :  { %v1489_v45 = vmul.f32 %v2018_v51, %v1545_v36 }
 0x2c0   :  { %v1490_v25 = vadd.f32 %v1488_v43, %v1475_v44 }
 0x2c1   :  { %v1491_v8 = vadd.f32 %v1489_v45, %v1476_v12 }
 0x2c2   :  { %v2020_v19 = vpop.eup %2019  ;;  %v1505_v5 = vadd.f32 %v1503_v3, %v1490_v25 }
 0x2c3   :  { %v2022_v27 = vpop.eup %2021  ;;  %v1518_v63 = vmul.f32 %v2020_v19, %v1548_v22  ;;  %v1506_v18 = vadd.f32 %v1504_v41, %v1491_v8 }
 0x2c4   :  { %v1519_v60 = vmul.f32 %v2022_v27, %v1549_v53 }
 0x2c5   :  { %v1520_v57 = vadd.f32 %v1518_v63, %v1505_v5 }
 0x2c6   :  { %v1521_v31 = vadd.f32 %v1519_v60, %v1506_v18 }
 0x2c7   :  { %v1526_v13 = vmul.f32 %v1524_v58, %v1520_v57 }
 0x2c8   :  { %v1527_v10 = vmul.f32 %v1524_v58, %v1521_v31 }
 0x2c9   :  { %1528 = vst [vmem:[%s2902_s4] sm:$0xff] %v1526_v13 }
 0x2ca   :  { %1529 = vst [vmem:[%s2902_s4 + $0x8] sm:$0xff] %v1527_v10 }

</bundles_post_ra>
